<compile_context>
chip_gen: v7x
topology: tpu7x:2x2x1
jax: 0.10.0
libtpu: 0.0.40
codegen_flags: <defaults>
</compile_context>

<pallas_src>
import functools

import jax
import jax.numpy as jnp
from jax.experimental import pallas as pl
from jax.experimental.pallas import tpu as pltpu


def _round_up(a, b):
    return (a + b - 1) // b * b


def _vmem_limit_bytes():
    """Generation-aware scoped-VMEM limit with headroom vs. physical capacity."""
    try:
        cap = int(pltpu.get_tpu_info().vmem_capacity_bytes)
    except Exception:
        cap = 64 * 1024 * 1024  # conservative fallback: v7x physical VMEM
    # ~8 MiB headroom for Mosaic internal scratch / resident params /
    # double-buffer bookkeeping; never request more than ~110 MiB.
    return int(max(32 << 20, min(cap - (8 << 20), 110 << 20)))


def _pick_row_tile(rows, width, itemsize, vmem_limit):
    """Rows per grid step for a (rows, width) row-wise streaming kernel."""
    # Minimum sublane tile for the packed input dtype: 8 f32 / 16 bf16 / 32 int8.
    sub = max(8, 32 // itemsize)
    if rows <= sub:
        return rows                     # one full block (block == array dims)
    # Budget: double-buffered in+out DMA tiles plus the f32 working copies.
    per_row_bytes = width * (4 * itemsize + 12)
    tile = (vmem_limit // 2) // max(per_row_bytes, 1)
    # Byte-based cap (no fixed row-count cap): keep each DMA block <= ~8 MiB.
    tile = min(tile, max(1024, (8 << 20) // max(width * itemsize, 1)))
    # Keep >= 2 grid steps so v7x's two TensorCores both get work; costs at
    # most one extra ~0.35 us step on single-TC v5e/v6e.
    tile = min(tile, _round_up(pl.cdiv(rows, 2), sub))
    tile = min(tile, _round_up(rows, sub))
    tile = max(sub, (tile // sub) * sub)
    return tile


def _layernorm_kernel(x_ref, gamma_ref, beta_ref, o_ref, *, eps, d_model):
    x = x_ref[...].astype(jnp.float32)                       # (tm, D)
    mean = jnp.sum(x, axis=-1, keepdims=True) * (1.0 / d_model)
    xc = x - mean
    # Two-pass (centered) unbiased variance; d_model==1 -> 0/0 = NaN, same as
    # torch.std(ddof=1) on a single element.
    var = jnp.sum(xc * xc, axis=-1, keepdims=True) / (d_model - 1)
    denom = jnp.sqrt(var) + eps
    # EUP reciprocal (free VLIW slot) + one Newton step on the (tm,1) vector.
    inv = pl.reciprocal(denom, approx=True)
    inv = inv * (2.0 - denom * inv)
    out = xc * inv * gamma_ref[...].astype(jnp.float32) + beta_ref[...].astype(jnp.float32)
    o_ref[...] = out.astype(o_ref.dtype)


def _layernorm_packed_kernel(x_ref, gamma_ref, beta_ref, rmat_ref, bmat_ref,
                             o_ref, *, eps, d_model):
    # x is (tm, k*D): k = 128//D logical rows packed per lane-row so loads and
    # stores are lane-dense. Segmented reductions / broadcasts use the idle MXU
    # via 0/1 indicator matrices rmat (k*D, k) and bmat (k, k*D).
    x = x_ref[...].astype(jnp.float32)                       # (tm, k*D)
    rmat = rmat_ref[...]                                     # (k*D, k)
    bmat = bmat_ref[...]                                     # (k, k*D)
    mean_seg = jnp.dot(x, rmat, preferred_element_type=jnp.float32) * (1.0 / d_model)
    mean = jnp.dot(mean_seg, bmat, preferred_element_type=jnp.float32)   # broadcast back
    xc = x - mean
    var_seg = jnp.dot(xc * xc, rmat, preferred_element_type=jnp.float32) / (d_model - 1)
    denom = jnp.sqrt(var_seg) + eps                          # (tm, k)
    inv = pl.reciprocal(denom, approx=True)
    inv = inv * (2.0 - denom * inv)
    inv_b = jnp.dot(inv, bmat, preferred_element_type=jnp.float32)       # (tm, k*D)
    out = xc * inv_b * gamma_ref[...].astype(jnp.float32) + beta_ref[...].astype(jnp.float32)
    o_ref[...] = out.astype(o_ref.dtype)


def layer_norm(x, gamma, beta, eps=0.001, row_tile=None):
    """x: (..., d_model). gamma, beta: (d_model,). Returns same shape/dtype as x."""
    orig_shape = x.shape
    d_model = orig_shape[-1]
    x2 = x.reshape(-1, d_model)
    rows = x2.shape[0]
    itemsize = jnp.dtype(x2.dtype).itemsize
    vmem_limit = _vmem_limit_bytes()

    def _align(t, n_rows):
        sub = max(8, 32 // itemsize)
        if n_rows <= sub:
            return n_rows
        t = min(max(t, sub), _round_up(n_rows, sub))
        return max(sub, (t // sub) * sub)

    k = (128 // d_model) if 0 < d_model < 128 else 1
    use_packed = (1 < d_model < 128 and 128 % d_model == 0 and k > 1
                  and rows % k == 0)

    if use_packed:
        width = k * d_model
        prows = rows // k
        xw = x2.reshape(prows, width)                        # contiguous: free
        gamma_w = jnp.tile(gamma.reshape(-1).astype(x.dtype), k).reshape(1, width)
        beta_w = jnp.tile(beta.reshape(-1).astype(x.dtype), k).reshape(1, width)
        seg = jnp.arange(width, dtype=jnp.int32) // d_model
        rmat = (seg[:, None] == jnp.arange(k, dtype=jnp.int32)[None, :]).astype(jnp.float32)
        bmat = rmat.T

        tile = (_pick_row_tile(prows, width, itemsize, vmem_limit)
                if row_tile is None else _align(row_tile, prows))
        grid = (pl.cdiv(prows, tile),)   # partial last block; OOB writes dropped

        out = pl.pallas_call(
            functools.partial(_layernorm_packed_kernel, eps=eps, d_model=d_model),
            out_shape=jax.ShapeDtypeStruct((prows, width), x.dtype),
            grid_spec=pltpu.PrefetchScalarGridSpec(
                num_scalar_prefetch=0,
                grid=grid,
                in_specs=[
                    pl.BlockSpec((tile, width), lambda i: (i, 0)),
                    # gamma/beta and the indicator matrices stay resident.
                    pl.BlockSpec((1, width), lambda i: (0, 0)),
                    pl.BlockSpec((1, width), lambda i: (0, 0)),
                    pl.BlockSpec((width, k), lambda i: (0, 0)),
                    pl.BlockSpec((k, width), lambda i: (0, 0)),
                ],
                out_specs=pl.BlockSpec((tile, width), lambda i: (i, 0)),
            ),
            compiler_params=pltpu.CompilerParams(
                dimension_semantics=("parallel",),
                vmem_limit_bytes=vmem_limit,
            ),
        )(xw, gamma_w, beta_w, rmat, bmat)
        return out.reshape(orig_shape)

    # General path (d_model >= 128, or packing conditions not met).
    tile = (_pick_row_tile(rows, d_model, itemsize, vmem_limit)
            if row_tile is None else _align(row_tile, rows))
    grid = (pl.cdiv(rows, tile),)        # partial last block; OOB writes dropped

    gamma2 = gamma.reshape(1, d_model).astype(x.dtype)
    beta2 = beta.reshape(1, d_model).astype(x.dtype)

    out = pl.pallas_call(
        functools.partial(_layernorm_kernel, eps=eps, d_model=d_model),
        out_shape=jax.ShapeDtypeStruct((rows, d_model), x.dtype),
        grid_spec=pltpu.PrefetchScalarGridSpec(
            num_scalar_prefetch=0,
            grid=grid,
            in_specs=[
                pl.BlockSpec((tile, d_model), lambda i: (i, 0)),
                pl.BlockSpec((1, d_model), lambda i: (0, 0)),
                pl.BlockSpec((1, d_model), lambda i: (0, 0)),
            ],
            out_specs=pl.BlockSpec((tile, d_model), lambda i: (i, 0)),
        ),
        compiler_params=pltpu.CompilerParams(
            dimension_semantics=("parallel",),
            vmem_limit_bytes=vmem_limit,
        ),
    )(x2, gamma2, beta2)
    return out.reshape(orig_shape)


if __name__ == "__main__":
    batch, seq, d_model = 2, 8, 32
    key = jax.random.PRNGKey(0)
    x = jax.random.normal(key, (batch, seq, d_model), dtype=jnp.float32)

    # Deterministic parameter init matching the module's __init__:
    gamma = jnp.ones((d_model,), dtype=jnp.float32)
    beta = jnp.zeros((d_model,), dtype=jnp.float32)
    eps = 0.001

    out = jax.block_until_ready(layer_norm(x, gamma, beta, eps=eps))

    # Pure-JAX reference (unbiased std, eps added to std — matches the PyTorch
    # module's torch.std(...) + eps semantics).
    mean = jnp.mean(x, axis=-1, keepdims=True)
    std = jnp.std(x, axis=-1, keepdims=True, ddof=1)
    ref = (x - mean) / (std + eps) * gamma + beta

    assert out.shape == x.shape and out.dtype == x.dtype
    assert jnp.allclose(out, ref, atol=1e-5, rtol=1e-5), "mismatch vs reference"
    print("KERNEL_OK")
</pallas_src>

<mosaic_0001>
module attributes {stable_mosaic.version = 11 : i64} {
  func.func @_layernorm_packed_kernel(%arg0: i32, %arg1: memref<4x128xf32, #tpu.memory_space<vmem>>, %arg2: memref<1x128xf32, #tpu.memory_space<vmem>>, %arg3: memref<1x128xf32, #tpu.memory_space<vmem>>, %arg4: memref<128x4xf32, #tpu.memory_space<vmem>>, %arg5: memref<4x128xf32, #tpu.memory_space<vmem>>, %arg6: memref<4x128xf32, #tpu.memory_space<vmem>>) attributes {dimension_semantics = [#tpu.dimension_semantics<parallel>], iteration_bounds = array<i64: 1>, scalar_prefetch = 0 : i64, scratch_operands = 0 : i64, tpu.core_type = #tpu.core_type<tc>, window_params = [{transform_indices = @transform_0, window_bounds = array<i64: 4, 128>}, {pipeline_mode = #tpu.pipeline_mode<synchronous>, transform_indices = @transform_1, window_bounds = array<i64: 1, 128>}, {pipeline_mode = #tpu.pipeline_mode<synchronous>, transform_indices = @transform_2, window_bounds = array<i64: 1, 128>}, {pipeline_mode = #tpu.pipeline_mode<synchronous>, transform_indices = @transform_3, window_bounds = array<i64: 128, 4>}, {pipeline_mode = #tpu.pipeline_mode<synchronous>, transform_indices = @transform_4, window_bounds = array<i64: 4, 128>}, {transform_indices = @transform_5, window_bounds = array<i64: 4, 128>}]} {
    %c0 = arith.constant 0 : index
    %c0_0 = arith.constant 0 : index
    %0 = vector.load %arg1[%c0, %c0_0] : memref<4x128xf32, #tpu.memory_space<vmem>>, vector<4x128xf32>
    %c0_1 = arith.constant 0 : index
    %c0_2 = arith.constant 0 : index
    %1 = vector.load %arg4[%c0_1, %c0_2] : memref<128x4xf32, #tpu.memory_space<vmem>>, vector<128x4xf32>
    %c0_3 = arith.constant 0 : index
    %c0_4 = arith.constant 0 : index
    %2 = vector.load %arg5[%c0_3, %c0_4] : memref<4x128xf32, #tpu.memory_space<vmem>>, vector<4x128xf32>
    %cst = arith.constant dense<0.000000e+00> : vector<4x4xf32>
    %3 = tpu.matmul %0, %1, %cst {dimension_numbers = #tpu.dot_dimension_numbers<[1], [0], [0], [1], [0, 0, 1, 1], [], []>} : vector<4x128xf32>, vector<128x4xf32>, vector<4x4xf32> -> vector<4x4xf32>
    %cst_5 = arith.constant 3.125000e-02 : f32
    %4 = vector.broadcast %cst_5 : f32 to vector<4x4xf32>
    %5 = arith.mulf %3, %4 : vector<4x4xf32>
    %cst_6 = arith.constant dense<0.000000e+00> : vector<4x128xf32>
    %6 = tpu.matmul %5, %2, %cst_6 {dimension_numbers = #tpu.dot_dimension_numbers<[1], [0], [0], [1], [0, 0, 1, 1], [], []>} : vector<4x4xf32>, vector<4x128xf32>, vector<4x128xf32> -> vector<4x128xf32>
    %7 = arith.subf %0, %6 : vector<4x128xf32>
    %8 = arith.mulf %7, %7 : vector<4x128xf32>
    %cst_7 = arith.constant dense<0.000000e+00> : vector<4x4xf32>
    %9 = tpu.matmul %8, %1, %cst_7 {dimension_numbers = #tpu.dot_dimension_numbers<[1], [0], [0], [1], [0, 0, 1, 1], [], []>} : vector<4x128xf32>, vector<128x4xf32>, vector<4x4xf32> -> vector<4x4xf32>
    %cst_8 = arith.constant 3.100000e+01 : f32
    %10 = vector.broadcast %cst_8 : f32 to vector<4x4xf32>
    %11 = arith.divf %9, %10 : vector<4x4xf32>
    %12 = math.sqrt %11 : vector<4x4xf32>
    %cst_9 = arith.constant 1.000000e-03 : f32
    %13 = vector.broadcast %cst_9 : f32 to vector<4x4xf32>
    %14 = arith.addf %12, %13 : vector<4x4xf32>
    %15 = tpu.reciprocal %14 {approx = true} : vector<4x4xf32> -> vector<4x4xf32>
    %16 = arith.mulf %14, %15 : vector<4x4xf32>
    %cst_10 = arith.constant 2.000000e+00 : f32
    %17 = vector.broadcast %cst_10 : f32 to vector<4x4xf32>
    %18 = arith.subf %17, %16 : vector<4x4xf32>
    %19 = arith.mulf %15, %18 : vector<4x4xf32>
    %cst_11 = arith.constant dense<0.000000e+00> : vector<4x128xf32>
    %20 = tpu.matmul %19, %2, %cst_11 {dimension_numbers = #tpu.dot_dimension_numbers<[1], [0], [0], [1], [0, 0, 1, 1], [], []>} : vector<4x4xf32>, vector<4x128xf32>, vector<4x128xf32> -> vector<4x128xf32>
    %21 = arith.mulf %7, %20 : vector<4x128xf32>
    %c0_12 = arith.constant 0 : index
    %c0_13 = arith.constant 0 : index
    %22 = vector.load %arg2[%c0_12, %c0_13] : memref<1x128xf32, #tpu.memory_space<vmem>>, vector<1x128xf32>
    %23 = vector.broadcast %22 : vector<1x128xf32> to vector<4x128xf32>
    %24 = arith.mulf %21, %23 : vector<4x128xf32>
    %c0_14 = arith.constant 0 : index
    %c0_15 = arith.constant 0 : index
    %25 = vector.load %arg3[%c0_14, %c0_15] : memref<1x128xf32, #tpu.memory_space<vmem>>, vector<1x128xf32>
    %26 = vector.broadcast %25 : vector<1x128xf32> to vector<4x128xf32>
    %27 = arith.addf %24, %26 : vector<4x128xf32>
    %c0_16 = arith.constant 0 : index
    %c0_17 = arith.constant 0 : index
    %28 = vector.load %arg6[%c0_16, %c0_17] : memref<4x128xf32, #tpu.memory_space<vmem>>, vector<4x128xf32>
    tpu.vector_store %arg6[%c0_16, %c0_17], %27 {strides = array<i32>} : memref<4x128xf32, #tpu.memory_space<vmem>>, vector<4x128xf32>,
    return
  }
  func.func @transform_0(%arg0: i32) -> (i32, i32) {
    %c0_i32 = arith.constant 0 : i32
    %c0_i32_0 = arith.constant 0 : i32
    return %arg0, %c0_i32 : i32, i32
  }
  func.func @transform_1(%arg0: i32) -> (i32, i32) {
    %c0_i32 = arith.constant 0 : i32
    %c0_i32_0 = arith.constant 0 : i32
    %c0_i32_1 = arith.constant 0 : i32
    return %c0_i32, %c0_i32_0 : i32, i32
  }
  func.func @transform_2(%arg0: i32) -> (i32, i32) {
    %c0_i32 = arith.constant 0 : i32
    %c0_i32_0 = arith.constant 0 : i32
    %c0_i32_1 = arith.constant 0 : i32
    return %c0_i32, %c0_i32_0 : i32, i32
  }
  func.func @transform_3(%arg0: i32) -> (i32, i32) {
    %c0_i32 = arith.constant 0 : i32
    %c0_i32_0 = arith.constant 0 : i32
    %c0_i32_1 = arith.constant 0 : i32
    return %c0_i32, %c0_i32_0 : i32, i32
  }
  func.func @transform_4(%arg0: i32) -> (i32, i32) {
    %c0_i32 = arith.constant 0 : i32
    %c0_i32_0 = arith.constant 0 : i32
    %c0_i32_1 = arith.constant 0 : i32
    return %c0_i32, %c0_i32_0 : i32, i32
  }
  func.func @transform_5(%arg0: i32) -> (i32, i32) {
    %c0_i32 = arith.constant 0 : i32
    %c0_i32_0 = arith.constant 0 : i32
    return %arg0, %c0_i32 : i32, i32
  }
}

</mosaic_0001>

<bundles_post_ra>
// kernel: tpu_custom_call.1
= control target key start
LH: loop header
LB: loop body
LE: loop exit
PB: predicated region body
PF: predicated region fallthrough
CT: control target
= control target key end

     0   :  { %v583_v3 = vmov 0.0|0.0   ;;  %vm584_vm0 = vmmov 0   ;;  %v585_v6 = vmov 0.0   ;;  %s711_s0 = inlined_call_operand.vmem [shape: f32[4,128], index: 0, kind: input, shape index: {}]   ;;  %s712_s1 = inlined_call_operand.vmem [shape: f32[1,128], index: 1, kind: input, shape index: {}]   ;;  %s713_s2 = inlined_call_operand.vmem [shape: f32[1,128], index: 2, kind: input, shape index: {}]   ;;  %s714_s3 = inlined_call_operand.vmem [shape: f32[128,4], index: 3, kind: input, shape index: {}]   ;;  %s715_s4 = inlined_call_operand.vmem [shape: f32[4,128], index: 4, kind: input, shape index: {}]   ;;  %s716_s5 = inlined_call_operand.hbm [shape: f32[4,128], index: 5, kind: output, shape index: {}]  }
   0x1   :  { %v22_v0 = vld [vmem:[%s714_s3] sm:$0xff]  ;;  %v23_v1 = vld [vmem:[%s714_s3 + $0x8] sm:$0xff]  ;;  %v24_v2 = vld [vmem:[%s714_s3 + $0x10] sm:$0xff]  ;;  %503 = vmatprep.subr.bf16.mxu0 %v583_v3  ;;  %455 = vmatprep.mubr.msk.f32.mxu0 %vm584_vm0, %v585_v6 }
   0x2   :  { %v504_v4 = vpack.c.bf16 %v23_v1, %v22_v0  ;;  %v25_v5 = vld [vmem:[%s714_s3 + $0x18] sm:$0xff]  ;;  %458 = vmatprep.subr.mxu1 %v585_v6  ;;  %460 = vmatprep.mubr.msk.f32.mxu1 %vm584_vm0, %v585_v6  ;;  %v26_v8 = vld [vmem:[%s714_s3 + $0x20] sm:$0xff]  ;;  %v27_v9 = vld [vmem:[%s714_s3 + $0x28] sm:$0xff] }
   0x3   :  { %v507_v7 = vpack.c.bf16 %v25_v5, %v24_v2 }
   0x4   :  { %505 = vmatpush3.bf16.msra.mxu0 %v504_v4 }
   0x5   :  { %506 = vmatprep.subr.bf16.mxu0 %v583_v3 }
   0x6   :  { %10 = vsyncpa [#allocation3], 0  ;;  %v510_v10 = vpack.c.bf16 %v27_v9, %v26_v8  ;;  %v28_v11 = vld [vmem:[%s714_s3 + $0x30] sm:$0xff]  ;;  %v29_v12 = vld [vmem:[%s714_s3 + $0x38] sm:$0xff]  ;;  %vm114_vm1 = vcmask 1043456   ;;  %vm110_vm2 = vcmask 31744  }
   0x7   :  { %v513_v13 = vpack.c.bf16 %v29_v12, %v28_v11  ;;  %v30_v14 = vld [vmem:[%s714_s3 + $0x40] sm:$0xff]  ;;  %v31_v15 = vld [vmem:[%s714_s3 + $0x48] sm:$0xff]  ;;  %v32_v17 = vld [vmem:[%s714_s3 + $0x50] sm:$0xff]  ;;  %s586_s30 = smov [#allocation2]  }
   0x8   :  { %508 = vmatpush3.bf16.msra.mxu0 %v507_v7  ;;  %v516_v16 = vpack.c.bf16 %v31_v15, %v30_v14  ;;  %v33_v18 = vld [vmem:[%s714_s3 + $0x58] sm:$0xff]  ;;  %v34_v20 = vld [vmem:[%s714_s3 + $0x60] sm:$0xff]  ;;  %v35_v21 = vld [vmem:[%s714_s3 + $0x68] sm:$0xff]  ;;  %s371_s6 = sshll.u32 %s586_s30, 4  ;;  %s372_s6 = int_to_ptr.vmem [resolvable:$true] %s371_s6 }
   0x9   :  { %509 = vmatprep.subr.bf16.mxu0 %v583_v3  ;;  %v519_v19 = vpack.c.bf16 %v33_v18, %v32_v17  ;;  %v522_v22 = vpack.c.bf16 %v35_v21, %v34_v20  ;;  %v36_v23 = vld [vmem:[%s714_s3 + $0x70] sm:$0xff]  ;;  %v37_v24 = vld [vmem:[%s714_s3 + $0x78] sm:$0xff]  ;;  %v21_v26 = vld [vmem:[%s711_s0] sm:$0xf]  ;;  %s559_s7 = scalar_lea.vmem %s372_s6, 64  ;;  %p564_p1 = scmp.lt.s32.totalorder %s372_s6, %s372_s6 }
   0xa   :  { %v525_v25 = vpack.c.bf16 %v37_v24, %v36_v23  ;;  %v38_v27 = vld [vmem:[%s715_s4] sm:$0xf]  ;;  %p560_p0 = scmp.ne.s32.totalorder %s372_s6, %s559_s7  ;;  %p565_p2 = scmp.lt.s32.totalorder %s559_s7, %s559_s7 }
   0xb   :  { %459 = vmatpush3.msk.msra.mxu1 %vm114_vm1, %v38_v27  ;;  %v383_v49 = vld [vmem:[%s712_s1] ss:$0 sm:$0xff] }
   0xc   :  { %511 = vmatpush3.bf16.msra.mxu0 %v510_v10  ;;  %527 = vmatprep.subr.bf16.mxu1 %v583_v3  ;;  %v384_v52 = vld [vmem:[%s713_s2] ss:$0 sm:$0xff]  ;;  %p566_p3 = por %p565_p2, %p564_p1 }
   0xd   :  { %512 = vmatprep.subr.bf16.mxu0 %v583_v3 }
   0xe   :  { %p567_p4 = pnand %p566_p3, %p560_p0 }
  0x10   :  { %514 = vmatpush3.bf16.msra.mxu0 %v513_v13 }
  0x11   :  { %515 = vmatprep.subr.bf16.mxu0 %v583_v3 }
  0x14   :  { %517 = vmatpush3.bf16.msra.mxu0 %v516_v16 }
  0x15   :  { %518 = vmatprep.subr.bf16.mxu0 %v583_v3 }
  0x18   :  { %520 = vmatpush3.bf16.msra.mxu0 %v519_v19 }
  0x19   :  { %521 = vmatprep.subr.bf16.mxu0 %v583_v3 }
  0x1c   :  { %523 = vmatpush3.bf16.msra.mxu0 %v522_v22 }
  0x1d   :  { %524 = vmatprep.subr.bf16.mxu0 %v583_v3 }
  0x20   :  { %526 = vmatpush3.bf16.msra.mxu0 %v525_v25 }
  0x21   :  { %498 = vmatprep.subr.mxu0 %v585_v6 }
  0x23   :  { %456 = vmatmul.mubr.f32.vlgmr.msra.gmra.mrb[0].mxu0 %v21_v26 }
  0x24   :  { %500 = vmatprep.mubr.msk.f32.mxu0 %vm584_vm0, %v585_v6  ;;  %499 = vmatpush3.msk.msra.mxu0 %vm114_vm1, %v38_v27 }
  0xf6   :  { %v105_v28 = vpop.f32.mrb[0].mxu0 }
  0xf7   :  { %v109_v29 = vmul.f32 0.03125, %v105_v28  ;;  %v457_v30 = vpop.f32.mrb[1].mxu0 }
  0xf9   :  { %461 = vmatmul.mubr.msk.f32.vlgmr.msra.gmra.mrb[0].mxu1 %vm110_vm2, %v109_v29 }
  0xfa   :  { %529 = vmatpush3.bf16.msra.mxu1 %v504_v4  ;;  %495 = vmatprep.mubr.msk.f32.mxu1 %vm584_vm0, %v585_v6 }
  0xfb   :  { %530 = vmatprep.subr.bf16.mxu1 %v583_v3 }
  0xfe   :  { %532 = vmatpush3.bf16.msra.mxu1 %v507_v7 }
  0xff   :  { %533 = vmatprep.subr.bf16.mxu1 %v583_v3 }
 0x102   :  { %535 = vmatpush3.bf16.msra.mxu1 %v510_v10 }
 0x103   :  { %536 = vmatprep.subr.bf16.mxu1 %v583_v3 }
 0x106   :  { %538 = vmatpush3.bf16.msra.mxu1 %v513_v13 }
 0x107   :  { %539 = vmatprep.subr.bf16.mxu1 %v583_v3 }
 0x10a   :  { %541 = vmatpush3.bf16.msra.mxu1 %v516_v16 }
 0x10b   :  { %542 = vmatprep.subr.bf16.mxu1 %v583_v3 }
 0x10e   :  { %544 = vmatpush3.bf16.msra.mxu1 %v519_v19 }
 0x10f   :  { %545 = vmatprep.subr.bf16.mxu1 %v583_v3 }
 0x112   :  { %547 = vmatpush3.bf16.msra.mxu1 %v522_v22 }
 0x113   :  { %548 = vmatprep.subr.bf16.mxu1 %v583_v3 }
 0x116   :  { %550 = vmatpush3.bf16.msra.mxu1 %v525_v25 }
 0x1cc   :  { %v184_v31 = vpop.f32.mrb[0].mxu1 }
 0x1cd   :  { %v188_v32 = vsub.f32 %v21_v26, %v184_v31  ;;  %v462_v33 = vpop.f32.mrb[1].mxu1 }
 0x1cf   :  { %v189_v34 = vmul.f32 %v188_v32, %v188_v32 }
 0x1d1   :  { %496 = vmatmul.mubr.f32.vlgmr.msra.gmra.mrb[2].mxu1 %v189_v34 }
 0x2a4   :  { %v256_v35 = vpop.f32.mrb[2].mxu1 }
 0x2a5   :  { %v261_v36 = vmul.f32 0.032258064, %v256_v35  ;;  %v497_v37 = vpop.f32.mrb[3].mxu1 }
 0x2a7   :  { %555 = vrsqrt.f32 %v261_v36  ;;  %vm264_vm3 = vcmp.eq.f32.partialorder %v261_v36, inf  ;;  %v267_v40 = vand.u32 2147483648, %v261_v36  ;;  %vm266_vm4 = vcmp.eq.f32.partialorder %v261_v36, 0.0 }
 0x2b1   :  { %v556_v38 = vpop.eup %555 }
 0x2b2   :  { %v263_v39 = vmul.f32 %v556_v38, %v261_v36 }
 0x2b4   :  { %v265_v41 = vsel %vm264_vm3, %v261_v36, %v263_v39 }
 0x2b5   :  { %v268_v42 = vsel %vm266_vm4, %v267_v40, %v265_v41 }
 0x2b6   :  { %v269_v43 = vadd.f32 0.001, %v268_v42 }
 0x2b8   :  { %557 = vrcp.f32 %v269_v43 }
 0x2c2   :  { %v558_v44 = vpop.eup %557 }
 0x2c3   :  { %v271_v45 = vmul.f32 %v558_v44, %v269_v43 }
 0x2c5   :  { %v272_v46 = vsub.f32 2.0, %v271_v45 }
 0x2c7   :  { %v273_v47 = vmul.f32 %v558_v44, %v272_v46 }
 0x2c9   :  { %501 = vmatmul.mubr.msk.f32.vlgmr.msra.gmra.mrb[2].mxu0 %vm110_vm2, %v273_v47 }
 0x39c   :  { %v343_v48 = vpop.f32.mrb[2].mxu0 }
 0x39d   :  { %v347_v50 = vmul.f32 %v343_v48, %v188_v32  ;;  %v502_v51 = vpop.f32.mrb[3].mxu0 }
 0x39f   :  { %v355_v53 = vmul.f32 %v383_v49, %v347_v50 }
 0x3a1   :  { %v363_v54 = vadd.f32 %v384_v52, %v355_v53 }
 0x3a3   :  { %364 = vst [vmem:[#allocation2] sm:$0xf] %v363_v54 }
 0x3a4   :  { %570 = shalt.err (!%p567_p4)
}
 0x3a5   :  { %s571_s9 = scalar_lea.hbm %s716_s5, 64 }
 0x3a6   :  { %p572_p5 = scmp.ne.s32.totalorder %s716_s5, %s571_s9  ;;  %p575_p6 = scmp.lt.u32.totalorder %s571_s9, %s716_s5 }
 0x3a8   :  { %p577_p7 = pnand %p575_p6, %p572_p5 }
 0x3aa   :  { %580 = shalt.err (!%p577_p7)
}
 0x3ab   :  { %374 = dma.vmem_to_hbm [thread:$0]  %s372_s6, 64, %s716_s5, [#allocation3]  }
 0x3ac   :  { %581 = dma.done.wait [#allocation3], 64  }
 0x3ad   :  { %582 = vsyncadd [#allocation3], 4294967232 }
 0x3ae   :  { %378 = vsyncpa [#allocation3], 1 }

</bundles_post_ra>
